<compile_context>
chip_gen: v6e
topology: v6e:2x2x1
jax: 0.10.0
libtpu: 0.0.40
codegen_flags: <defaults>
</compile_context>

<pallas_src>
import functools

import jax
import jax.numpy as jnp
from jax.experimental import pallas as pl
from jax.experimental.pallas import tpu as pltpu

_LANE = 128
_SUBLANE = 8


def _dice_kernel(logits_ref, targets_ref, inter_ref, denom_ref,
                 inter_acc, denom_acc,
                 *, hw: int, thw: int, tiles_per_split: int, has_ragged: bool):
    # logits_ref : (1, C, THW)  f32 or bf16
    # targets_ref: (1, 1, THW)  integer labels
    # inter_ref  : (1, 1, C, 1) f32 partial intersection (per split, per n)
    # denom_ref  : (1, 1, C, 1) f32 partial (sum p + sum one_hot)
    # inter_acc  : (C, 1)       f32 scratch accumulator
    # denom_acc  : (C, 1)       f32 scratch accumulator
    s = pl.program_id(0)
    k = pl.program_id(2)
    nk = pl.num_programs(2)

    @pl.when(k == 0)
    def _init():
        inter_acc[...] = jnp.zeros_like(inter_acc)
        denom_acc[...] = jnp.zeros_like(denom_acc)

    x = logits_ref[0].astype(jnp.float32)          # (C, THW)
    t = targets_ref[0].astype(jnp.int32)           # (1, THW)
    C = x.shape[0]

    # Softmax over the channel (sublane) axis.
    m = jnp.max(x, axis=0, keepdims=True)
    e = jnp.exp(x - m)
    z = jnp.sum(e, axis=0, keepdims=True)
    # EUP approx reciprocal + one Newton step (error well below 1e-5).
    r = pl.reciprocal(z, approx=True)
    r = r * (2.0 - z * r)
    p = e * r                                      # (C, THW) softmax probs

    chan = jax.lax.broadcasted_iota(jnp.int32, (C, thw), 0)
    hit = chan == t                                # (C, THW) bool one-hot mask

    def _accum(valid):
        if valid is None:
            pm, hv = p, hit
        else:
            # Mask p first: OOB lanes can hold NaN/Inf from exp of garbage.
            pm = jnp.where(valid, p, 0.0)
            hv = jnp.logical_and(hit, valid)
        inter_acc[...] += jnp.sum(jnp.where(hv, pm, 0.0),
                                  axis=1, keepdims=True)
        denom_acc[...] += jnp.sum(pm + jnp.where(hv, 1.0, 0.0),
                                  axis=1, keepdims=True)

    gk = s * tiles_per_split + k                   # global spatial tile index

    if has_ragged:
        is_ragged = (gk + 1) * thw > hw

        @pl.when(jnp.logical_not(is_ragged))
        def _full_tile():
            _accum(None)

        @pl.when(is_ragged)
        def _ragged_tile():
            lane = jax.lax.broadcasted_iota(jnp.int32, (1, thw), 1)
            _accum((gk * thw + lane) < hw)
    else:
        _accum(None)

    @pl.when(k == nk - 1)
    def _finalize():
        inter_ref[0, 0] = inter_acc[...]
        denom_ref[0, 0] = denom_acc[...]


def dice_loss_segmentation(logits, targets, smooth: float = 1.0,
                           tile_lanes=None):
    """Pallas equivalent of DiceLossSegmentation.forward.

    Args:
      logits : (N, C, H, W) float32 or bfloat16 predicted logits.
      targets: (N, H, W) integer class labels.
      smooth : dice smoothing constant.
      tile_lanes: optional override of the spatial tile width (in pixels).
    Returns:
      scalar dice loss.
    """
    N, C, H, W = logits.shape
    HW = H * W

    # Keep bf16/f32 logits as-is (no extra HBM pass); upcast anything else.
    if logits.dtype not in (jnp.float32, jnp.bfloat16):
        logits = logits.astype(jnp.float32)
    logits_flat = logits.reshape(N, C, HW)

    # Narrow integer targets are DMA'd natively and cast inside the kernel.
    if targets.dtype not in (jnp.int8, jnp.uint8, jnp.int16, jnp.int32):
        targets = targets.astype(jnp.int32)
    targets_flat = targets.reshape(N, 1, HW)

    in_itemsize = jnp.dtype(logits_flat.dtype).itemsize
    tgt_itemsize = jnp.dtype(targets_flat.dtype).itemsize
    c_pad = -(-C // _SUBLANE) * _SUBLANE

    # Generation-aware VMEM budget (v5e/v6e: 128 MiB, v7x: 64 MiB per TC).
    try:
        vmem_phys = int(pltpu.get_tpu_info().vmem_capacity_bytes)
    except Exception:  # no TPU info available -> assume the smallest (v7x)
        vmem_phys = 64 * 1024 * 1024

    if tile_lanes is None:
        budget = int(0.35 * vmem_phys)
        per_lane = (2 * c_pad * in_itemsize    # logits double buffer
                    + 2 * _SUBLANE * 4         # targets double buffer (padded)
                    + 8 * c_pad * 4)           # f32 compute temporaries
        tile_lanes = min(65536, max(_LANE, budget // per_lane))
    thw = max(_LANE, (tile_lanes // _LANE) * _LANE)
    if HW <= thw:
        thw = HW                               # single tile covers all pixels
    num_tiles = -(-HW // thw)

    # v7x: use both TensorCores when the batch axis alone can't (N == 1).
    splits = 2 if (N == 1 and num_tiles >= 2) else 1
    tiles_per_split = -(-num_tiles // splits)
    # Ragged/out-of-range tiles exist iff the padded split grid overshoots HW.
    has_ragged = splits * tiles_per_split * thw != HW
    last_tile = num_tiles - 1

    def in_map(s, n, k):
        # Clamp so padded tiles of the last split never DMA out of bounds;
        # their contribution is fully masked out inside the kernel.
        return (n, 0, jnp.minimum(s * tiles_per_split + k, last_tile))

    def out_map(s, n, k):
        return (s, n, 0, 0)

    # VMEM estimate: logits + targets double buffers, f32 temporaries,
    # tiny accumulators/outputs.  Capped at ~80% of physical VMEM.
    est = (2 * c_pad * thw * in_itemsize
           + 2 * _SUBLANE * thw * 4
           + 8 * c_pad * thw * 4
           + 8 * c_pad * _LANE * 4)
    vmem_limit = int(min(max(int(1.25 * est), 16 * 1024 * 1024),
                         int(0.8 * vmem_phys)))

    cost = pl.CostEstimate(
        flops=10 * N * C * HW,
        transcendentals=N * C * HW,
        bytes_accessed=N * HW * (C * in_itemsize + tgt_itemsize)
        + 2 * splits * N * C * 4,
    )

    kernel = functools.partial(_dice_kernel, hw=HW, thw=thw,
                               tiles_per_split=tiles_per_split,
                               has_ragged=has_ragged)

    inter, denom = pl.pallas_call(
        kernel,
        out_shape=(jax.ShapeDtypeStruct((splits, N, C, 1), jnp.float32),
                   jax.ShapeDtypeStruct((splits, N, C, 1), jnp.float32)),
        grid_spec=pltpu.PrefetchScalarGridSpec(
            num_scalar_prefetch=0,
            grid=(splits, N, tiles_per_split),
            in_specs=[
                pl.BlockSpec((1, C, thw), in_map),
                pl.BlockSpec((1, 1, thw), in_map),
            ],
            out_specs=[
                pl.BlockSpec((1, 1, C, 1), out_map),
                pl.BlockSpec((1, 1, C, 1), out_map),
            ],
            scratch_shapes=[
                pltpu.VMEM((C, 1), jnp.float32),   # inter accumulator
                pltpu.VMEM((C, 1), jnp.float32),   # merged denom accumulator
            ],
        ),
        compiler_params=pltpu.CompilerParams(
            dimension_semantics=("parallel", "parallel", "arbitrary"),
            vmem_limit_bytes=vmem_limit,
        ),
        cost_estimate=cost,
    )(logits_flat, targets_flat)

    # Combine per-split partials and form the dice loss (O(N*C) scalars).
    inter = jnp.sum(inter[..., 0], axis=0)         # (N, C)
    denom = jnp.sum(denom[..., 0], axis=0)         # (N, C)
    dice = (2.0 * inter + float(smooth)) / (denom + float(smooth))
    return 1.0 - jnp.mean(dice)


def _reference_dice_loss(logits, targets, smooth: float = 1.0):
    # Pure-JAX reference mirroring the PyTorch module.
    p = jax.nn.softmax(logits.astype(jnp.float32), axis=1)          # (N,C,H,W)
    one_hot = jax.nn.one_hot(targets, logits.shape[1], axis=1,
                             dtype=jnp.float32)                     # (N,C,H,W)
    inter = jnp.sum(p * one_hot, axis=(2, 3))
    dice = (2.0 * inter + smooth) / (
        jnp.sum(p, axis=(2, 3)) + jnp.sum(one_hot, axis=(2, 3)) + smooth)
    return 1.0 - jnp.mean(dice)


if __name__ == "__main__":
    key = jax.random.PRNGKey(0)
    k1, k2, k3, k4, k5, k6 = jax.random.split(key, 6)

    # Small shape consistent with the module: batch=2, channels=4, spatial=16.
    N, C, H, W = 2, 4, 16, 16
    logits = jax.random.normal(k1, (N, C, H, W), dtype=jnp.float32)
    targets = jax.random.randint(k2, (N, H, W), 0, C, dtype=jnp.int32)
    loss = jax.block_until_ready(dice_loss_segmentation(logits, targets, 1.0))
    ref = jax.block_until_ready(_reference_dice_loss(logits, targets, 1.0))
    assert jnp.allclose(loss, ref, atol=1e-5, rtol=1e-5), (loss, ref)

    # Multi-tile + ragged-last-tile masking path.
    N2, C2, H2, W2 = 2, 3, 18, 18        # HW = 324 -> 3 tiles of 128, ragged
    logits2 = jax.random.normal(k3, (N2, C2, H2, W2), dtype=jnp.float32)
    targets2 = jax.random.randint(k4, (N2, H2, W2), 0, C2, dtype=jnp.int32)
    loss2 = jax.block_until_ready(
        dice_loss_segmentation(logits2, targets2, 1.0, tile_lanes=128))
    ref2 = jax.block_until_ready(_reference_dice_loss(logits2, targets2, 1.0))
    assert jnp.allclose(loss2, ref2, atol=1e-5, rtol=1e-5), (loss2, ref2)

    # N == 1 path: spatial split across two grid-parallel chunks (exercises the
    # clamped index_map, a fully out-of-range padded tile, and a ragged tile),
    # plus bf16 logits.
    N3, C3, H3, W3 = 1, 4, 18, 18        # HW = 324 -> 3 tiles, 2 splits of 2
    logits3 = jax.random.normal(k5, (N3, C3, H3, W3),
                                dtype=jnp.float32).astype(jnp.bfloat16)
    targets3 = jax.random.randint(k6, (N3, H3, W3), 0, C3, dtype=jnp.int32)
    loss3 = jax.block_until_ready(
        dice_loss_segmentation(logits3, targets3, 1.0, tile_lanes=128))
    ref3 = jax.block_until_ready(_reference_dice_loss(logits3, targets3, 1.0))
    assert jnp.allclose(loss3, ref3, atol=2e-3, rtol=2e-3), (loss3, ref3)

    print("KERNEL_OK")
</pallas_src>

<mosaic_0001>
module attributes {stable_mosaic.version = 11 : i64} {
  func.func @_dice_kernel(%arg0: i32, %arg1: i32, %arg2: i32, %arg3: memref<1x4x256xf32, #tpu.memory_space<vmem>>, %arg4: memref<1x1x256xi32, #tpu.memory_space<vmem>>, %arg5: memref<1x1x4x1xf32, #tpu.memory_space<vmem>>, %arg6: memref<1x1x4x1xf32, #tpu.memory_space<vmem>>, %arg7: memref<4x1xf32, #tpu.memory_space<vmem>>, %arg8: memref<4x1xf32, #tpu.memory_space<vmem>>) attributes {dimension_semantics = [#tpu.dimension_semantics<parallel>, #tpu.dimension_semantics<parallel>, #tpu.dimension_semantics<arbitrary>], iteration_bounds = array<i64: 1, 2, 1>, scalar_prefetch = 0 : i64, scratch_operands = 2 : i64, tpu.core_type = #tpu.core_type<tc>, window_params = [{transform_indices = @transform_0, window_bounds = array<i64: 1, 4, 256>}, {transform_indices = @transform_1, window_bounds = array<i64: 1, 1, 256>}, {transform_indices = @transform_2, window_bounds = array<i64: 1, 1, 4, 1>}, {transform_indices = @transform_3, window_bounds = array<i64: 1, 1, 4, 1>}]} {
    %c0_i32 = arith.constant 0 : i32
    %0 = arith.cmpi eq, %arg2, %c0_i32 : i32
    %1 = arith.extui %0 : i1 to i32
    %c0_i32_0 = arith.constant 0 : i32
    %2 = arith.cmpi ne, %1, %c0_i32_0 : i32
    scf.if %2 {
      %cst_23 = arith.constant 0.000000e+00 : f32
      %43 = vector.broadcast %cst_23 : f32 to vector<4x1xf32>
      %c0_24 = arith.constant 0 : index
      %c0_25 = arith.constant 0 : index
      %44 = vector.load %arg7[%c0_24, %c0_25] : memref<4x1xf32, #tpu.memory_space<vmem>>, vector<4x1xf32>
      tpu.vector_store %arg7[%c0_24, %c0_25], %43 {strides = array<i32>} : memref<4x1xf32, #tpu.memory_space<vmem>>, vector<4x1xf32>,
      %cst_26 = arith.constant 0.000000e+00 : f32
      %45 = vector.broadcast %cst_26 : f32 to vector<4x1xf32>
      %c0_27 = arith.constant 0 : index
      %c0_28 = arith.constant 0 : index
      %46 = vector.load %arg8[%c0_27, %c0_28] : memref<4x1xf32, #tpu.memory_space<vmem>>, vector<4x1xf32>
      tpu.vector_store %arg8[%c0_27, %c0_28], %45 {strides = array<i32>} : memref<4x1xf32, #tpu.memory_space<vmem>>, vector<4x1xf32>,
    } else {
    }
    %c0 = arith.constant 0 : index
    %c0_1 = arith.constant 0 : index
    %c0_2 = arith.constant 0 : index
    %3 = vector.load %arg3[%c0, %c0_1, %c0_2] : memref<1x4x256xf32, #tpu.memory_space<vmem>>, vector<1x4x256xf32>
    %4 = vector.shape_cast %3 : vector<1x4x256xf32> to vector<4x256xf32>
    %c0_3 = arith.constant 0 : index
    %c0_4 = arith.constant 0 : index
    %c0_5 = arith.constant 0 : index
    %5 = vector.load %arg4[%c0_3, %c0_4, %c0_5] : memref<1x1x256xi32, #tpu.memory_space<vmem>>, vector<1x1x256xi32>
    %6 = vector.shape_cast %5 : vector<1x1x256xi32> to vector<1x256xi32>
    %cst = arith.constant dense<0xFF800000> : vector<256xf32>
    %7 = vector.multi_reduction <maximumf>, %4, %cst [0] : vector<4x256xf32> to vector<256xf32>
    %8 = vector.shape_cast %7 : vector<256xf32> to vector<1x256xf32>
    %9 = vector.broadcast %8 : vector<1x256xf32> to vector<4x256xf32>
    %10 = arith.subf %4, %9 : vector<4x256xf32>
    %11 = math.exp %10 : vector<4x256xf32>
    %cst_6 = arith.constant dense<0.000000e+00> : vector<256xf32>
    %12 = vector.multi_reduction <add>, %11, %cst_6 [0] : vector<4x256xf32> to vector<256xf32>
    %13 = vector.shape_cast %12 : vector<256xf32> to vector<1x256xf32>
    %14 = tpu.reciprocal %13 {approx = true} : vector<1x256xf32> -> vector<1x256xf32>
    %15 = arith.mulf %13, %14 : vector<1x256xf32>
    %cst_7 = arith.constant 2.000000e+00 : f32
    %16 = vector.broadcast %cst_7 : f32 to vector<1x256xf32>
    %17 = arith.subf %16, %15 : vector<1x256xf32>
    %18 = arith.mulf %14, %17 : vector<1x256xf32>
    %19 = vector.broadcast %18 : vector<1x256xf32> to vector<4x256xf32>
    %20 = arith.mulf %11, %19 : vector<4x256xf32>
    %21 = tpu.iota {dimensions = array<i32: 0>} : vector<4x256xi32>
    %22 = vector.broadcast %6 : vector<1x256xi32> to vector<4x256xi32>
    %23 = arith.cmpi eq, %21, %22 : vector<4x256xi32>
    %c0_8 = arith.constant 0 : index
    %c0_9 = arith.constant 0 : index
    %24 = vector.load %arg7[%c0_8, %c0_9] : memref<4x1xf32, #tpu.memory_space<vmem>>, vector<4x1xf32>
    %cst_10 = arith.constant 0.000000e+00 : f32
    %25 = vector.broadcast %cst_10 : f32 to vector<4x256xf32>
    %26 = arith.select %23, %20, %25 : vector<4x256xi1>, vector<4x256xf32>
    %cst_11 = arith.constant dense<0.000000e+00> : vector<4xf32>
    %27 = vector.multi_reduction <add>, %26, %cst_11 [1] : vector<4x256xf32> to vector<4xf32>
    %28 = vector.shape_cast %27 : vector<4xf32> to vector<4x1xf32>
    %29 = arith.addf %24, %28 : vector<4x1xf32>
    %c0_12 = arith.constant 0 : index
    %c0_13 = arith.constant 0 : index
    %30 = vector.load %arg7[%c0_12, %c0_13] : memref<4x1xf32, #tpu.memory_space<vmem>>, vector<4x1xf32>
    tpu.vector_store %arg7[%c0_12, %c0_13], %29 {strides = array<i32>} : memref<4x1xf32, #tpu.memory_space<vmem>>, vector<4x1xf32>,
    %c0_14 = arith.constant 0 : index
    %c0_15 = arith.constant 0 : index
    %31 = vector.load %arg8[%c0_14, %c0_15] : memref<4x1xf32, #tpu.memory_space<vmem>>, vector<4x1xf32>
    %cst_16 = arith.constant 1.000000e+00 : f32
    %cst_17 = arith.constant 0.000000e+00 : f32
    %32 = vector.broadcast %cst_16 : f32 to vector<4x256xf32>
    %33 = vector.broadcast %cst_17 : f32 to vector<4x256xf32>
    %34 = arith.select %23, %32, %33 : vector<4x256xi1>, vector<4x256xf32>
    %35 = arith.addf %20, %34 : vector<4x256xf32>
    %cst_18 = arith.constant dense<0.000000e+00> : vector<4xf32>
    %36 = vector.multi_reduction <add>, %35, %cst_18 [1] : vector<4x256xf32> to vector<4xf32>
    %37 = vector.shape_cast %36 : vector<4xf32> to vector<4x1xf32>
    %38 = arith.addf %31, %37 : vector<4x1xf32>
    %c0_19 = arith.constant 0 : index
    %c0_20 = arith.constant 0 : index
    %39 = vector.load %arg8[%c0_19, %c0_20] : memref<4x1xf32, #tpu.memory_space<vmem>>, vector<4x1xf32>
    tpu.vector_store %arg8[%c0_19, %c0_20], %38 {strides = array<i32>} : memref<4x1xf32, #tpu.memory_space<vmem>>, vector<4x1xf32>,
    %c0_i32_21 = arith.constant 0 : i32
    %40 = arith.cmpi eq, %arg2, %c0_i32_21 : i32
    %41 = arith.extui %40 : i1 to i32
    %c0_i32_22 = arith.constant 0 : i32
    %42 = arith.cmpi ne, %41, %c0_i32_22 : i32
    scf.if %42 {
      %c0_23 = arith.constant 0 : index
      %c0_24 = arith.constant 0 : index
      %43 = vector.load %arg7[%c0_23, %c0_24] : memref<4x1xf32, #tpu.memory_space<vmem>>, vector<4x1xf32>
      %c0_25 = arith.constant 0 : index
      %c0_26 = arith.constant 0 : index
      %c0_27 = arith.constant 0 : index
      %c0_28 = arith.constant 0 : index
      %44 = vector.load %arg5[%c0_25, %c0_26, %c0_27, %c0_28] : memref<1x1x4x1xf32, #tpu.memory_space<vmem>>, vector<1x1x4x1xf32>
      %45 = vector.shape_cast %44 : vector<1x1x4x1xf32> to vector<4x1xf32>
      %46 = vector.shape_cast %43 : vector<4x1xf32> to vector<1x1x4x1xf32>
      tpu.vector_store %arg5[%c0_25, %c0_26, %c0_27, %c0_28], %46 {strides = array<i32>} : memref<1x1x4x1xf32, #tpu.memory_space<vmem>>, vector<1x1x4x1xf32>,
      %c0_29 = arith.constant 0 : index
      %c0_30 = arith.constant 0 : index
      %47 = vector.load %arg8[%c0_29, %c0_30] : memref<4x1xf32, #tpu.memory_space<vmem>>, vector<4x1xf32>
      %c0_31 = arith.constant 0 : index
      %c0_32 = arith.constant 0 : index
      %c0_33 = arith.constant 0 : index
      %c0_34 = arith.constant 0 : index
      %48 = vector.load %arg6[%c0_31, %c0_32, %c0_33, %c0_34] : memref<1x1x4x1xf32, #tpu.memory_space<vmem>>, vector<1x1x4x1xf32>
      %49 = vector.shape_cast %48 : vector<1x1x4x1xf32> to vector<4x1xf32>
      %50 = vector.shape_cast %47 : vector<4x1xf32> to vector<1x1x4x1xf32>
      tpu.vector_store %arg6[%c0_31, %c0_32, %c0_33, %c0_34], %50 {strides = array<i32>} : memref<1x1x4x1xf32, #tpu.memory_space<vmem>>, vector<1x1x4x1xf32>,
    } else {
    }
    return
  }
  func.func @transform_0(%arg0: i32, %arg1: i32, %arg2: i32) -> (i32, i32, i32) {
    %c1_i32 = arith.constant 1 : i32
    %0 = arith.muli %arg0, %c1_i32 : i32
    %1 = arith.addi %0, %arg2 : i32
    %c0_i32 = arith.constant 0 : i32
    %2 = arith.minsi %1, %c0_i32 : i32
    %c0_i32_0 = arith.constant 0 : i32
    %c0_i32_1 = arith.constant 0 : i32
    return %arg1, %c0_i32_0, %2 : i32, i32, i32
  }
  func.func @transform_1(%arg0: i32, %arg1: i32, %arg2: i32) -> (i32, i32, i32) {
    %c1_i32 = arith.constant 1 : i32
    %0 = arith.muli %arg0, %c1_i32 : i32
    %1 = arith.addi %0, %arg2 : i32
    %c0_i32 = arith.constant 0 : i32
    %2 = arith.minsi %1, %c0_i32 : i32
    %c0_i32_0 = arith.constant 0 : i32
    %c0_i32_1 = arith.constant 0 : i32
    return %arg1, %c0_i32_0, %2 : i32, i32, i32
  }
  func.func @transform_2(%arg0: i32, %arg1: i32, %arg2: i32) -> (i32, i32, i32, i32) {
    %c0_i32 = arith.constant 0 : i32
    %c0_i32_0 = arith.constant 0 : i32
    %c0_i32_1 = arith.constant 0 : i32
    return %arg0, %arg1, %c0_i32, %c0_i32_0 : i32, i32, i32, i32
  }
  func.func @transform_3(%arg0: i32, %arg1: i32, %arg2: i32) -> (i32, i32, i32, i32) {
    %c0_i32 = arith.constant 0 : i32
    %c0_i32_0 = arith.constant 0 : i32
    %c0_i32_1 = arith.constant 0 : i32
    return %arg0, %arg1, %c0_i32, %c0_i32_0 : i32, i32, i32, i32
  }
}

</mosaic_0001>

<bundles_post_ra>
// kernel: tpu_custom_call.1
= control target key start
LH: loop header
LB: loop body
LE: loop exit
PB: predicated region body
PF: predicated region fallthrough
CT: control target
= control target key end

     0   :  { %9 = vsyncpa [#allocation5], 0  ;;  %s962_s0 = inlined_call_operand.hbm [shape: f32[2,4,256], index: 0, kind: input, shape index: {}]   ;;  %s963_s1 = inlined_call_operand.hbm [shape: s32[2,1,256], index: 1, kind: input, shape index: {}]   ;;  %s964_s2 = inlined_call_operand.vmem [shape: f32[1,2,4,1], index: 2, kind: output, shape index: {0}]   ;;  %s965_s3 = inlined_call_operand.vmem [shape: f32[1,2,4,1], index: 3, kind: output, shape index: {1}]  }
   0x1   :  { %11 = vsyncpa [#allocation5 + $0x1], 0 }
   0x2   :  { %12 = vsyncpa [#allocation7], 0 }
   0x3   :  { %14 = vsyncpa [#allocation7 + $0x1], 0  ;;  %s814_s12 = smov 0   ;;  %s816_s13 = smov 0  }
   0x4   :  { %s818_s14 = smov 0   ;;  %s820_s15 = smov 0  }
   0x5   :  { %s822_s16 = smov 0   ;;  %s824_s17 = smov 0  }
   0x6 LB: > { %s592_s18 = sadd.s32 4294967295, %s789_s17   ;;  %s35_s19 = sadd.s32 1, %s785_s16  ;;  %s789_s17 = sphi %s824_s17, %s20_s17   ;;  %s785_s16 = sphi %s822_s16, %s974_s16   ;;  %s781_s15 = sphi %s820_s15, %s973_s15   ;;  %s777_s14 = sphi %s818_s14, %s972_s14   ;;  %s773_s13 = sphi %s816_s13, %s971_s13   ;;  %s769_s12 = sphi %s814_s12, %s970_s12  }
   0x7   : > { %p37_p0 = scmp.ge.s32.totalorder %s35_s19, 2  ;;  %s54_s20 = sadd.s32 1, %s777_s14 }
   0x8   : > { %p61_p1 = scmp.ne.s32.totalorder %s777_s14, %s773_s13  ;;  %p62_p2 = scmp.eq.s32.totalorder %s789_s17, 0 }
   0x9   : > { %s976_s19 = smov (%p37_p0, %s35_s19), 0  ;;  %p67_p4 = scmp.ne.s32.totalorder %s773_s13, %s769_s12 }
   0xa   : > { %p850_p3 = por %p62_p2, %p61_p1  ;;  %s49_s22 = ssub.s32 %s785_s16, %s976_s19 }
   0xb   : > { %p68_p5 = scmp.eq.s32.totalorder %s592_s18, 0  ;;  %p52_p6 = scmp.eq.s32.totalorder %s49_s22, 0 }
   0xc   : > { %p622_p8 = scmp.lt.s32.totalorder %s789_s17, 2  ;;  %s866_s25 = sand.u32 1, %s777_s14  }
   0xd   : > { %p857_p7 = por %p68_p5, %p67_p4  ;;  %s609_s26 = sshll.u32 %s785_s16, 7 }
   0xe   : > { %s863_s24 = scalar_select %p52_p6, %s777_s14, %s54_s20  }
   0xf   : > { %s596_s27 = sshll.u32 %s866_s25, 3  ;;  %s196_s30 = scalar_lea.hbm %s962_s0, %s609_s26 }
  0x10   : > { %s185_s4 = scalar_lea.vmem [#allocation4], %s596_s27  ;;  %p875_p9 = pnand %p622_p8, %p850_p3 }
  0x11   : > { %s198_s5 = sshll.u32 %s185_s4, 4  ;;  %p602_p10 = scmp.ge.s32.totalorder %s789_s17, 1  ;;  %s199_s5 = int_to_ptr.vmem [resolvable:$true] %s198_s5 }
  0x12   : > { %p227_p11 = scmp.lt.s32.totalorder %s789_s17, 3  ;;  %s182_s7 = scalar_lea.sflag [#allocation5], %s866_s25 }
  0x13   : > { %p681_p12 = pneg %p875_p9  ;;  %s692_s8 = scalar_lea.vmem %s199_s5, 128 }
  0x14   : > { %p693_p13 = scmp.ne.s32.totalorder %s199_s5, %s692_s8  ;;  %s791_s9 = smov [#allocation4]  }
  0x15   : > { %s697_s10 = sshll.u32 %s791_s9, 4  ;;  %s698_s10 = int_to_ptr.vmem [resolvable:$false] %s697_s10 }
  0x16   : > { %p695_p0 = pnand %p693_p13, %p681_p12  ;;  %s699_s11 = scalar_lea.vmem %s698_s10, 256 }
  0x17   : > { %p700_p2 = scmp.lt.s32.totalorder %s199_s5, %s698_s10  ;;  %p701_p3 = scmp.lt.s32.totalorder %s699_s11, %s692_s8 }
  0x18   : > { %p696_p1 = pneg %p695_p0 }
  0x19   : > { %p702_p4 = por %p701_p3, %p700_p2 }
  0x1b   : > { %p703_p5 = pnand %p702_p4, %p696_p1 }
  0x1d   : > { %706 = shalt.err (!%p703_p5)
}
  0x1e   : > { %618 = dma.hbm_to_vmem [thread:$0]  (!%p875_p9), %s196_s30, 128, %s199_s5, %s182_s7  }
  0x1f   : > { %p893_p6 = pnand %p602_p10, %p227_p11  ;;  %s599_s18 = sshll.u32 %s866_s25, 1 }
  0x20   : > { %s610_s20 = sshll.u32 %s785_s16, 5  ;;  %s209_s27 = scalar_lea.vmem [#allocation6], %s599_s18 }
  0x21   : > { %s220_s26 = scalar_lea.hbm %s963_s1, %s610_s20  ;;  %s222_s28 = sshll.u32 %s209_s27, 4  ;;  %s223_s28 = int_to_ptr.vmem [resolvable:$true] %s222_s28 }
  0x22   : > { %s206_s29 = scalar_lea.sflag [#allocation7], %s866_s25  ;;  %s720_s4 = scalar_lea.vmem %s223_s28, 32 }
  0x23   : > { %p721_p8 = scmp.ne.s32.totalorder %s223_s28, %s720_s4  ;;  %s792_s30 = smov [#allocation6]  }
  0x24   : > { %s725_s5 = sshll.u32 %s792_s30, 4  ;;  %s726_s5 = int_to_ptr.vmem [resolvable:$false] %s725_s5 }
  0x25   : > { %p723_p13 = pnand %p721_p8, %p681_p12  ;;  %s727_s7 = scalar_lea.vmem %s726_s5, 64 }
  0x26   : > { %p728_p10 = scmp.lt.s32.totalorder %s223_s28, %s726_s5  ;;  %p729_p11 = scmp.lt.s32.totalorder %s727_s7, %s720_s4 }
  0x27   : > { %p724_p0 = pneg %p723_p13 }
  0x28   : > { %p730_p1 = por %p729_p11, %p728_p10 }
  0x2a   : > { %p731_p2 = pnand %p730_p1, %p724_p0 }
  0x2c   : > { %734 = shalt.err (!%p731_p2)
}
  0x2d   : > { %621 = dma.hbm_to_vmem [thread:$0]  (!%p875_p9), %s220_s26, 32, %s223_s28, %s206_s29  }
  0x2e   : > { %231 = sbr.rel (%p893_p6) target bundleno = 289 (0x121), region = 28  ;;  %s233_s25 = sand.u32 (!%p893_p6), 1, %s773_s13  }
  0x2f   : > { %s603_s8 = sshll.u32 (!%p893_p6), %s233_s25, 3  ;;  %s234_s9 = scalar_lea.sflag (!%p893_p6), [#allocation5], %s233_s25 }
  0x30   : > { %s237_s10 = scalar_lea.vmem (!%p893_p6), [#allocation4], %s603_s8 }
  0x33   : > { %760 = dma.done.wait (%p857_p7), %s234_s9, 128  }
  0x34   : > { %762 = vsyncadd (%p857_p7), %s234_s9, 4294967168  ;;  %s604_s11 = sshll.u32 %s233_s25, 1  ;;  %s243_s18 = scalar_lea.sflag [#allocation7], %s233_s25 }
  0x35   : > { %s915_s20 = scalar_lea.vmem [#allocation6], %s604_s11 }
  0x36   : > { %764 = dma.done.wait (%p857_p7), %s243_s18, 32  }
  0x37   : > { %766 = vsyncadd (%p857_p7), %s243_s18, 4294967264  ;;  %vm313_vm0 = vcmask 3072   ;;  %v793_v0 = vmov 0.0   ;;  %vm321_vm1 = vcmask 1043456   ;;  %v316_v1 = vld [vmem:[%s237_s10] sm:$0xff]  ;;  %v373_v36 = vlaneseq  ;;  %p295_p7 = scmp.lt.s32.totalorder %s781_s15, 1 }
  0x38   : > { %314 = vst.msk [vmem:[#allocation2] sm:$0xf] %vm313_vm0, %v793_v0  ;;  %315 = vst.msk [vmem:[#allocation3] sm:$0xf] %vm313_vm0, %v793_v0  ;;  %v319_v2 = vcombine.high %v316_v1, %v316_v1  ;;  %v322_v3 = vsel %vm321_vm1, %v316_v1, -inf }
  0x39   : > { %v323_v4 = vrot.slane %v322_v3, 4  ;;  %v374_v37 = vshrl.u32 %v373_v36, 7  ;;  %v317_v40 = vld [vmem:[%s915_s20] sm:$0x3]  ;;  %s978_s15 = smov (!%p295_p7, %s781_s15), 1 }
  0x3a   : > { %v329_v5 = vsel %vm321_vm1, %v319_v2, -inf  ;;  %s605_s23 = sshll.u32 %s978_s15, 2 }
  0x3b   : > { %v324_v6 = vmax.f32 %v322_v3, %v323_v4  ;;  %v330_v7 = vrot.slane %v329_v5, 4  ;;  %v377_v38 = vsub.s32 0, %v374_v37  ;;  %v381_v39 = vsub.s32 1, %v374_v37  ;;  %s300_s21 = scalar_lea.vmem %s964_s2, %s605_s23  ;;  %s308_s27 = scalar_lea.vmem %s965_s3, %s605_s23 }
  0x3d   : > { %v325_v8 = vrot.slane %v324_v6, 2  ;;  %v331_v9 = vmax.f32 %v329_v5, %v330_v7  ;;  %v378_v41 = vrot.slane %v317_v40, %v377_v38  ;;  %v382_v42 = vrot.slane %v317_v40, %v381_v39 }
  0x3f   : > { %v326_v10 = vmax.f32 %v324_v6, %v325_v8  ;;  %v332_v11 = vrot.slane %v331_v9, 2  ;;  %vm383_vm2 = vcmp.eq.s32.totalorder %v374_v37, %v378_v41  ;;  %vm384_vm3 = vcmp.eq.s32.totalorder %v374_v37, %v382_v42  ;;  %v385_v3 = vld [vmem:[#allocation2] sm:$0xf]  ;;  %v399_v6 = vld [vmem:[#allocation3] sm:$0xf] }
  0x40   : > { %v400_v50 = vsel %vm383_vm2, 1.0, %v793_v0  ;;  %v401_v51 = vsel %vm384_vm3, 1.0, %v793_v0 }
  0x41   : > { %v327_v12 = vrot.slane %v326_v10, 1  ;;  %v333_v13 = vmax.f32 %v331_v9, %v332_v11  ;;  %v404_v54 = vcombine.low %v400_v50, %v401_v51 }
  0x43   : > { %v328_v14 = vmax.f32 %v326_v10, %v327_v12  ;;  %v334_v15 = vrot.slane %v333_v13, 1 }
  0x45   : > { %v335_v16 = vmax.f32 %v333_v13, %v334_v15 }
  0x47   : > { %v338_v17 = vcombine.low %v328_v14, %v335_v16 }
  0x49   : > { %v340_v18 = vsub.f32 %v316_v1, %v338_v17 }
  0x4b   : > { %v341_v19 = vmul.f32 1.442695, %v340_v18 }
  0x4d   : > { %673 = vpow2.f32 %v341_v19 }
  0x5a   : > { %v674_v20 = vpop.eup %673 }
  0x5b   : > { %v344_v21 = vcombine.high %v674_v20, %v674_v20  ;;  %v346_v22 = vsel %vm321_vm1, %v674_v20, 0.0 }
  0x5c   : > { %v347_v23 = vrot.slane %v346_v22, 4 }
  0x5d   : > { %v353_v24 = vsel %vm321_vm1, %v344_v21, 0.0 }
  0x5e   : > { %v348_v25 = vadd.f32 %v347_v23, %v346_v22  ;;  %v354_v26 = vrot.slane %v353_v24, 4 }
  0x60   : > { %v349_v27 = vrot.slane %v348_v25, 2  ;;  %v355_v28 = vadd.f32 %v354_v26, %v353_v24 }
  0x62   : > { %v350_v29 = vadd.f32 %v349_v27, %v348_v25  ;;  %v356_v30 = vrot.slane %v355_v28, 2 }
  0x64   : > { %v351_v31 = vrot.slane %v350_v29, 1  ;;  %v357_v32 = vadd.f32 %v356_v30, %v355_v28 }
  0x66   : > { %v352_v33 = vadd.f32 %v351_v31, %v350_v29  ;;  %v358_v34 = vrot.slane %v357_v32, 1 }
  0x68   : > { %v359_v35 = vadd.f32 %v358_v34, %v357_v32  ;;  %675 = vrcp.f32 %v352_v33 }
  0x6a   : > { %677 = vrcp.f32 %v359_v35 }
  0x75   : > { %v676_v43 = vpop.eup %675 }
  0x76   : > { %v362_v44 = vmul.f32 %v676_v43, %v352_v33 }
  0x77   : > { %v678_v45 = vpop.eup %677 }
  0x78   : > { %v363_v46 = vmul.f32 %v678_v45, %v359_v35  ;;  %v364_v47 = vsub.f32 2.0, %v362_v44 }
  0x7a   : > { %v365_v48 = vsub.f32 2.0, %v363_v46  ;;  %v366_v49 = vmul.f32 %v676_v43, %v364_v47 }
  0x7c   : > { %v367_v52 = vmul.f32 %v678_v45, %v365_v48 }
  0x7e   : > { %v370_v53 = vcombine.low %v366_v49, %v367_v52 }
  0x80   : > { %v372_v55 = vmul.f32 %v674_v20, %v370_v53 }
  0x82   : > { %v387_v56 = vcombine.high %v372_v55, %v372_v55  ;;  %v389_v57 = vsel %vm383_vm2, %v372_v55, 0.0  ;;  %v406_v58 = vadd.f32 %v404_v54, %v372_v55 }
  0x83   : > { %v391_v59 = vsel %vm321_vm1, %v389_v57, 0.0 }
  0x84   : > { %v390_v60 = vsel %vm384_vm3, %v387_v56, 0.0  ;;  %v408_v61 = vcombine.high %v406_v58, %v406_v58  ;;  %v410_v63 = vsel %vm321_vm1, %v406_v58, 0.0 }
  0x85   : > { %v392_v62 = vsel %vm321_vm1, %v390_v60, 0.0 }
  0x86   : > { %v393_v1 = vadd.f32 %v392_v62, %v391_v59  ;;  %v411_v0 = vsel %vm321_vm1, %v408_v61, 0.0 }
  0x87   : > { %v412_v2 = vadd.f32 %v411_v0, %v410_v63 }
  0x88   : > { %394 = vadd.xlane.f32.xlu0 %v393_v1 }
  0x8c   : > { %413 = vadd.xlane.f32.xlu0 %v412_v2 }
 0x111   : > { %v395_v4 = vpop.xlane.xlu0 %394 }
 0x112   : > { %v396_v5 = vadd.f32 %v395_v4, %v385_v3 }
 0x114   : > { %398 = vst.msk [vmem:[#allocation2] sm:$0xf] %vm313_vm0, %v396_v5 }
 0x115   : > { %v414_v7 = vpop.xlane.xlu0 %413 }
 0x116   : > { %v415_v8 = vadd.f32 %v414_v7, %v399_v6 }
 0x118   : > { %416 = vst.msk [vmem:[#allocation3] sm:$0xf] %vm313_vm0, %v415_v8 }
 0x11b   : > { %v420_v9 = vld [vmem:[#allocation2] sm:$0xf] }
 0x11c   : > { %421 = vst.msk [vmem:[%s300_s21] sm:$0xf] %vm313_vm0, %v420_v9 }
 0x11f   : > { %v422_v10 = vld [vmem:[#allocation3] sm:$0xf] }
 0x120   : > { %423 = vst.msk [vmem:[%s308_s27] sm:$0xf] %vm313_vm0, %v422_v10 }
 0x121 PF: > { %s20_s17 = sadd.s32 1, %s789_s17   ;;  %s970_s12 = smov %s773_s13 }
 0x122   : > { %p17_p9 = scmp.ge.s32.totalorder %s20_s17, 4   ;;  %s971_s13 = smov %s777_s14 }
 0x123   : > { %s972_s14 = smov %s863_s24  ;;  %s973_s15 = smov %s785_s16 }
 0x124   : > { %s974_s16 = smov %s976_s19  ;;  %19 = sbr.rel (!%p17_p9) target bundleno = 6 (0x6), region = 101 }
 0x129   :  { %473 = vsyncpa [#allocation5], 1 }
 0x12a   :  { %475 = vsyncpa [#allocation5 + $0x1], 1 }
 0x12b   :  { %476 = vsyncpa [#allocation7], 1 }
 0x12c   :  { %478 = vsyncpa [#allocation7 + $0x1], 1 }

</bundles_post_ra>
